<compile_context>
chip_gen: v5e
topology: v5e:2x2
jax: 0.10.0
libtpu: 0.0.40
codegen_flags: <defaults>
</compile_context>

<pallas_src>
import functools

import jax
import jax.numpy as jnp
from jax import lax
from jax.experimental import pallas as pl
from jax.experimental.pallas import tpu as pltpu


def _round_up(x, m):
    return ((x + m - 1) // m) * m


def _patchembed_kernel(x_ref, w_ref, b_ref, g_ref, beta_ref, o_ref, *, eps, d_valid):
    # x_ref:    (TM, K)   bf16 im2col'd patch rows for this grid step
    # w_ref:    (K, Dp)   bf16 flattened conv weight (VMEM-resident, const map)
    # b_ref:    (1, Dp)   f32 conv bias        (padded cols are 0)
    # g_ref:    (1, Dp)   f32 LayerNorm gamma  (padded cols are 0)
    # beta_ref: (1, Dp)   f32 LayerNorm beta   (padded cols are 0)
    # o_ref:    (TM, Dp)
    y = jnp.dot(x_ref[...], w_ref[...], preferred_element_type=jnp.float32)
    y = y + b_ref[...]

    d_pad = y.shape[-1]
    if d_valid == d_pad:
        # Real ViT path (D already a multiple of 128): plain LayerNorm.
        mean = jnp.mean(y, axis=-1, keepdims=True)
        cent = y - mean
        var = jnp.mean(cent * cent, axis=-1, keepdims=True)
    else:
        # D was padded up to a lane-dense multiple of 128: reduce over the
        # valid columns only (biased variance, like torch.nn.LayerNorm).
        lane = lax.broadcasted_iota(jnp.int32, y.shape, dimension=y.ndim - 1)
        valid = lane < d_valid
        inv_d = 1.0 / d_valid
        y = jnp.where(valid, y, 0.0)
        mean = jnp.sum(y, axis=-1, keepdims=True) * inv_d
        cent = jnp.where(valid, y - mean, 0.0)
        var = jnp.sum(cent * cent, axis=-1, keepdims=True) * inv_d

    norm = cent * lax.rsqrt(var + eps)
    o_ref[...] = (norm * g_ref[...] + beta_ref[...]).astype(o_ref.dtype)


def patch_embed_forward(inputs, proj_w, proj_b, ln_w, ln_b, *,
                        patch_size=16, eps=1e-6, row_tile=512,
                        compute_dtype=jnp.bfloat16,
                        vmem_budget_bytes=24 * 1024 * 1024):
    """Forward of `patchembed`.

    inputs: (B, C, H, W); proj_w: (D, C, P, P); proj_b/ln_w/ln_b: (D,)
    returns (B, num_patches, D) in inputs.dtype.
    """
    B, C, H, W = inputs.shape
    P = patch_size
    gh, gw = H // P, W // P
    N = gh * gw
    D = proj_w.shape[0]
    K = C * P * P
    assert proj_w.shape == (D, C, P, P)
    out_dtype = inputs.dtype

    # ---- im2col + low-precision cast, fused (one HBM layout pass, half bytes) ----
    # x[b, c, i*P+kh, j*P+kw] -> xp[b*N + i*gw + j, c*P*P + kh*P + kw]
    xp = inputs.astype(compute_dtype)
    xp = xp[:, :, : gh * P, : gw * P]                       # border drop (e.g. 159//16)
    xp = xp.reshape(B, C, gh, P, gw, P).transpose(0, 2, 4, 1, 3, 5)
    xp = xp.reshape(B * N, K)

    # conv weight flattened in the same (c, kh, kw) order -> (K, D), bf16
    wm = proj_w.reshape(D, K).T.astype(compute_dtype)

    # ---- pad embed dim to a lane-dense multiple of 128 (demo D=32 -> 128) ----
    Dp = max(_round_up(D, 128), 128)
    bias = proj_b.astype(jnp.float32)
    gamma = ln_w.astype(jnp.float32)
    beta = ln_b.astype(jnp.float32)
    if Dp != D:
        wm = jnp.pad(wm, ((0, 0), (0, Dp - D)))
        bias = jnp.pad(bias, (0, Dp - D))
        gamma = jnp.pad(gamma, (0, Dp - D))
        beta = jnp.pad(beta, (0, Dp - D))

    # ---- row tiling: big 16-aligned blocks, no jnp.pad of the (M, K) matrix ----
    M = B * N
    if M <= row_tile:
        tm = M                                   # single block == full array dim
    else:
        tm = _round_up(min(row_tile, M), 16)     # bf16 sublane packing alignment

    in_bytes = jnp.dtype(compute_dtype).itemsize
    out_bytes = jnp.dtype(out_dtype).itemsize

    def vmem_est(t):
        return (2 * t * K * in_bytes             # double-buffered x row block
                + 2 * K * Dp * in_bytes          # weight (const index_map)
                + 2 * 3 * Dp * 4                 # bias / gamma / beta
                + 2 * t * Dp * out_bytes         # double-buffered output block
                + t * Dp * 4)                    # f32 intermediate (dot -> LN)

    # Keep the largest tm that still double-buffers inside v7x's scoped budget.
    while tm > 256 and vmem_est(tm) > vmem_budget_bytes:
        tm = max(256, tm - 256)
    vmem_limit = int(min(64 * 1024 * 1024,
                         max(32 * 1024 * 1024, vmem_est(tm) * 5 // 4)))

    grid = (pl.cdiv(M, tm),)

    out = pl.pallas_call(
        functools.partial(_patchembed_kernel, eps=eps, d_valid=D),
        out_shape=jax.ShapeDtypeStruct((M, Dp), out_dtype),
        grid_spec=pltpu.PrefetchScalarGridSpec(
            num_scalar_prefetch=0,
            grid=grid,
            in_specs=[
                pl.BlockSpec((tm, K), lambda i: (i, 0)),   # patch rows (tiled)
                pl.BlockSpec((K, Dp), lambda i: (0, 0)),   # weight (resident)
                pl.BlockSpec((1, Dp), lambda i: (0, 0)),   # bias
                pl.BlockSpec((1, Dp), lambda i: (0, 0)),   # gamma
                pl.BlockSpec((1, Dp), lambda i: (0, 0)),   # beta
            ],
            out_specs=pl.BlockSpec((tm, Dp), lambda i: (i, 0)),
        ),
        compiler_params=pltpu.CompilerParams(
            dimension_semantics=("parallel",),   # v7x: row blocks split across both TCs
            vmem_limit_bytes=vmem_limit,
        ),
    )(xp, wm, bias.reshape(1, Dp), gamma.reshape(1, Dp), beta.reshape(1, Dp))

    return out[:, :D].reshape(B, N, D)


def _reference(inputs, proj_w, proj_b, ln_w, ln_b, patch_size, eps):
    """Plain-JAX f32 reference mirroring the PyTorch forward."""
    y = lax.conv_general_dilated(
        inputs, proj_w,
        window_strides=(patch_size, patch_size),
        padding="VALID",
        dimension_numbers=("NCHW", "OIHW", "NCHW"),
    )
    y = y + proj_b.reshape(1, -1, 1, 1)
    B, D, gh, gw = y.shape
    y = y.reshape(B, D, gh * gw).transpose(0, 2, 1)  # (B, N, D)
    mean = jnp.mean(y, axis=-1, keepdims=True)
    var = jnp.mean((y - mean) ** 2, axis=-1, keepdims=True)
    y = (y - mean) / jnp.sqrt(var + eps)
    return y * ln_w + ln_b


if __name__ == "__main__":
    # Small shapes consistent with the module's forward (the wrapper also
    # handles the 159//16 border-drop case of the original img_size).
    batch = 2
    in_c = 3
    img_size = 32
    patch_size = 16
    embed_dim = 32
    eps = 1e-6

    key = jax.random.PRNGKey(0)
    k_x, k_w, k_b, k_g, k_bt = jax.random.split(key, 5)

    x = jax.random.normal(k_x, (batch, in_c, img_size, img_size), dtype=jnp.float32)
    proj_w = 0.02 * jax.random.normal(
        k_w, (embed_dim, in_c, patch_size, patch_size), dtype=jnp.float32)
    proj_b = 0.01 * jax.random.normal(k_b, (embed_dim,), dtype=jnp.float32)
    ln_w = 1.0 + 0.1 * jax.random.normal(k_g, (embed_dim,), dtype=jnp.float32)
    ln_b = 0.1 * jax.random.normal(k_bt, (embed_dim,), dtype=jnp.float32)

    fwd = jax.jit(functools.partial(patch_embed_forward,
                                    patch_size=patch_size, eps=eps))
    out = jax.block_until_ready(fwd(x, proj_w, proj_b, ln_w, ln_b))

    num_patches = (img_size // patch_size) ** 2
    assert out.shape == (batch, num_patches, embed_dim)

    # Tight check vs. a reference fed the same bf16-rounded operands
    # (kernel accumulates in f32, so remaining diff is accumulation order only).
    ref_bf16_in = _reference(
        x.astype(jnp.bfloat16).astype(jnp.float32),
        proj_w.astype(jnp.bfloat16).astype(jnp.float32),
        proj_b, ln_w, ln_b, patch_size, eps)
    assert jnp.allclose(out, ref_bf16_in, atol=2e-2, rtol=2e-2), \
        "mismatch vs bf16-input reference"

    # Loose sanity check vs. the full-f32 reference (bf16 input rounding noise).
    ref_f32 = _reference(x, proj_w, proj_b, ln_w, ln_b, patch_size, eps)
    assert jnp.allclose(out, ref_f32, atol=1e-1, rtol=1e-1), \
        "mismatch vs f32 reference"

    print("KERNEL_OK")
</pallas_src>

<mosaic_0001>
module attributes {stable_mosaic.version = 11 : i64} {
  func.func @_patchembed_kernel(%arg0: i32, %arg1: memref<8x768xbf16, #tpu.memory_space<vmem>>, %arg2: memref<768x128xbf16, #tpu.memory_space<vmem>>, %arg3: memref<1x128xf32, #tpu.memory_space<vmem>>, %arg4: memref<1x128xf32, #tpu.memory_space<vmem>>, %arg5: memref<1x128xf32, #tpu.memory_space<vmem>>, %arg6: memref<8x128xf32, #tpu.memory_space<vmem>>) attributes {dimension_semantics = [#tpu.dimension_semantics<parallel>], iteration_bounds = array<i64: 1>, scalar_prefetch = 0 : i64, scratch_operands = 0 : i64, tpu.core_type = #tpu.core_type<tc>, window_params = [{transform_indices = @transform_0, window_bounds = array<i64: 8, 768>}, {pipeline_mode = #tpu.pipeline_mode<synchronous>, transform_indices = @transform_1, window_bounds = array<i64: 768, 128>}, {pipeline_mode = #tpu.pipeline_mode<synchronous>, transform_indices = @transform_2, window_bounds = array<i64: 1, 128>}, {pipeline_mode = #tpu.pipeline_mode<synchronous>, transform_indices = @transform_3, window_bounds = array<i64: 1, 128>}, {pipeline_mode = #tpu.pipeline_mode<synchronous>, transform_indices = @transform_4, window_bounds = array<i64: 1, 128>}, {transform_indices = @transform_5, window_bounds = array<i64: 8, 128>}]} {
    %c0 = arith.constant 0 : index
    %c0_0 = arith.constant 0 : index
    %0 = vector.load %arg1[%c0, %c0_0] : memref<8x768xbf16, #tpu.memory_space<vmem>>, vector<8x768xbf16>
    %c0_1 = arith.constant 0 : index
    %c0_2 = arith.constant 0 : index
    %1 = vector.load %arg2[%c0_1, %c0_2] : memref<768x128xbf16, #tpu.memory_space<vmem>>, vector<768x128xbf16>
    %cst = arith.constant dense<0.000000e+00> : vector<8x128xf32>
    %2 = tpu.matmul %0, %1, %cst {dimension_numbers = #tpu.dot_dimension_numbers<[1], [0], [0], [1], [0, 0, 1, 1], [], []>} : vector<8x768xbf16>, vector<768x128xbf16>, vector<8x128xf32> -> vector<8x128xf32>
    %c0_3 = arith.constant 0 : index
    %c0_4 = arith.constant 0 : index
    %3 = vector.load %arg3[%c0_3, %c0_4] : memref<1x128xf32, #tpu.memory_space<vmem>>, vector<1x128xf32>
    %4 = vector.broadcast %3 : vector<1x128xf32> to vector<8x128xf32>
    %5 = arith.addf %2, %4 : vector<8x128xf32>
    %6 = tpu.iota {dimensions = array<i32: 1>} : vector<8x128xi32>
    %c32_i32 = arith.constant 32 : i32
    %7 = vector.broadcast %c32_i32 : i32 to vector<8x128xi32>
    %8 = arith.cmpi slt, %6, %7 : vector<8x128xi32>
    %cst_5 = arith.constant 0.000000e+00 : f32
    %9 = vector.broadcast %cst_5 : f32 to vector<8x128xf32>
    %10 = arith.select %8, %5, %9 : vector<8x128xi1>, vector<8x128xf32>
    %cst_6 = arith.constant dense<0.000000e+00> : vector<8xf32>
    %11 = vector.multi_reduction <add>, %10, %cst_6 [1] : vector<8x128xf32> to vector<8xf32>
    %12 = vector.shape_cast %11 : vector<8xf32> to vector<8x1xf32>
    %cst_7 = arith.constant 3.125000e-02 : f32
    %13 = vector.broadcast %cst_7 : f32 to vector<8x1xf32>
    %14 = arith.mulf %12, %13 : vector<8x1xf32>
    %15 = vector.broadcast %14 : vector<8x1xf32> to vector<8x128xf32>
    %16 = arith.subf %10, %15 : vector<8x128xf32>
    %cst_8 = arith.constant 0.000000e+00 : f32
    %17 = vector.broadcast %cst_8 : f32 to vector<8x128xf32>
    %18 = arith.select %8, %16, %17 : vector<8x128xi1>, vector<8x128xf32>
    %19 = arith.mulf %18, %18 : vector<8x128xf32>
    %cst_9 = arith.constant dense<0.000000e+00> : vector<8xf32>
    %20 = vector.multi_reduction <add>, %19, %cst_9 [1] : vector<8x128xf32> to vector<8xf32>
    %21 = vector.shape_cast %20 : vector<8xf32> to vector<8x1xf32>
    %cst_10 = arith.constant 3.125000e-02 : f32
    %22 = vector.broadcast %cst_10 : f32 to vector<8x1xf32>
    %23 = arith.mulf %21, %22 : vector<8x1xf32>
    %cst_11 = arith.constant 9.99999997E-7 : f32
    %24 = vector.broadcast %cst_11 : f32 to vector<8x1xf32>
    %25 = arith.addf %23, %24 : vector<8x1xf32>
    %26 = math.rsqrt %25 : vector<8x1xf32>
    %27 = vector.broadcast %26 : vector<8x1xf32> to vector<8x128xf32>
    %28 = arith.mulf %18, %27 : vector<8x128xf32>
    %c0_12 = arith.constant 0 : index
    %c0_13 = arith.constant 0 : index
    %29 = vector.load %arg4[%c0_12, %c0_13] : memref<1x128xf32, #tpu.memory_space<vmem>>, vector<1x128xf32>
    %30 = vector.broadcast %29 : vector<1x128xf32> to vector<8x128xf32>
    %31 = arith.mulf %28, %30 : vector<8x128xf32>
    %c0_14 = arith.constant 0 : index
    %c0_15 = arith.constant 0 : index
    %32 = vector.load %arg5[%c0_14, %c0_15] : memref<1x128xf32, #tpu.memory_space<vmem>>, vector<1x128xf32>
    %33 = vector.broadcast %32 : vector<1x128xf32> to vector<8x128xf32>
    %34 = arith.addf %31, %33 : vector<8x128xf32>
    %c0_16 = arith.constant 0 : index
    %c0_17 = arith.constant 0 : index
    %35 = vector.load %arg6[%c0_16, %c0_17] : memref<8x128xf32, #tpu.memory_space<vmem>>, vector<8x128xf32>
    tpu.vector_store %arg6[%c0_16, %c0_17], %34 {strides = array<i32>} : memref<8x128xf32, #tpu.memory_space<vmem>>, vector<8x128xf32>,
    return
  }
  func.func @transform_0(%arg0: i32) -> (i32, i32) {
    %c0_i32 = arith.constant 0 : i32
    %c0_i32_0 = arith.constant 0 : i32
    return %arg0, %c0_i32 : i32, i32
  }
  func.func @transform_1(%arg0: i32) -> (i32, i32) {
    %c0_i32 = arith.constant 0 : i32
    %c0_i32_0 = arith.constant 0 : i32
    %c0_i32_1 = arith.constant 0 : i32
    return %c0_i32, %c0_i32_0 : i32, i32
  }
  func.func @transform_2(%arg0: i32) -> (i32, i32) {
    %c0_i32 = arith.constant 0 : i32
    %c0_i32_0 = arith.constant 0 : i32
    %c0_i32_1 = arith.constant 0 : i32
    return %c0_i32, %c0_i32_0 : i32, i32
  }
  func.func @transform_3(%arg0: i32) -> (i32, i32) {
    %c0_i32 = arith.constant 0 : i32
    %c0_i32_0 = arith.constant 0 : i32
    %c0_i32_1 = arith.constant 0 : i32
    return %c0_i32, %c0_i32_0 : i32, i32
  }
  func.func @transform_4(%arg0: i32) -> (i32, i32) {
    %c0_i32 = arith.constant 0 : i32
    %c0_i32_0 = arith.constant 0 : i32
    %c0_i32_1 = arith.constant 0 : i32
    return %c0_i32, %c0_i32_0 : i32, i32
  }
  func.func @transform_5(%arg0: i32) -> (i32, i32) {
    %c0_i32 = arith.constant 0 : i32
    %c0_i32_0 = arith.constant 0 : i32
    return %arg0, %c0_i32 : i32, i32
  }
}

</mosaic_0001>

<bundles_post_ra>
// kernel: patch_embed_forward.1
= control target key start
LH: loop header
LB: loop body
LE: loop exit
PB: predicated region body
PF: predicated region fallthrough
CT: control target
= control target key end

     0   :  { %s1031_s0 = inlined_call_operand.vmem [shape: bf16[8,768], index: 0, kind: input, shape index: {}]   ;;  %s1032_s1 = inlined_call_operand.vmem [shape: bf16[768,128], index: 1, kind: input, shape index: {}]   ;;  %s1033_s2 = inlined_call_operand.vmem [shape: f32[1,128], index: 2, kind: input, shape index: {}]   ;;  %s1034_s3 = inlined_call_operand.vmem [shape: f32[1,128], index: 3, kind: input, shape index: {}]   ;;  %s1035_s4 = inlined_call_operand.vmem [shape: f32[1,128], index: 4, kind: input, shape index: {}]   ;;  %s1036_s5 = inlined_call_operand.hbm [shape: f32[8,128], index: 5, kind: output, shape index: {}]  }
   0x1   :  { %v762_v0 = vld [vmem:[%s1032_s1 + $0x38] sm:$0xff]  ;;  %v761_v2 = vld [vmem:[%s1032_s1 + $0x30] sm:$0xff]  ;;  %v760_v8 = vld [vmem:[%s1032_s1 + $0x28] sm:$0xff] }
   0x2   :  { %v770_v1 = vld [vmem:[%s1032_s1 + $0x78] sm:$0xff]  ;;  %433 = vmatpush.bf16.msra.mxu0 %v762_v0  ;;  %v769_v3 = vld [vmem:[%s1032_s1 + $0x70] sm:$0xff]  ;;  %v768_v9 = vld [vmem:[%s1032_s1 + $0x68] sm:$0xff] }
   0x3   :  { %446 = vmatpush.bf16.msra.mxu1 %v770_v1  ;;  %v778_v4 = vld [vmem:[%s1032_s1 + $0xb8] sm:$0xff]  ;;  %v777_v6 = vld [vmem:[%s1032_s1 + $0xb0] sm:$0xff]  ;;  %v776_v10 = vld [vmem:[%s1032_s1 + $0xa8] sm:$0xff] }
   0x4   :  { %v786_v5 = vld [vmem:[%s1032_s1 + $0xf8] sm:$0xff]  ;;  %459 = vmatpush.bf16.msra.mxu2 %v778_v4  ;;  %v785_v7 = vld [vmem:[%s1032_s1 + $0xf0] sm:$0xff]  ;;  %v784_v11 = vld [vmem:[%s1032_s1 + $0xe8] sm:$0xff] }
   0x5   :  { %472 = vmatpush.bf16.msra.mxu3 %v786_v5  ;;  %v759_v12 = vld [vmem:[%s1032_s1 + $0x20] sm:$0xff]  ;;  %v758_v16 = vld [vmem:[%s1032_s1 + $0x18] sm:$0xff] }
   0x6   :  { %434 = vmatpush.bf16.msra.mxu0 %v761_v2  ;;  %v767_v13 = vld [vmem:[%s1032_s1 + $0x60] sm:$0xff]  ;;  %v766_v17 = vld [vmem:[%s1032_s1 + $0x58] sm:$0xff] }
   0x7   :  { %447 = vmatpush.bf16.msra.mxu1 %v769_v3  ;;  %v775_v14 = vld [vmem:[%s1032_s1 + $0xa0] sm:$0xff] }
   0x8   :  { %460 = vmatpush.bf16.msra.mxu2 %v777_v6  ;;  %v783_v15 = vld [vmem:[%s1032_s1 + $0xe0] sm:$0xff] }
   0x9   :  { %473 = vmatpush.bf16.msra.mxu3 %v785_v7 }
   0xa   :  { %435 = vmatpush.bf16.msra.mxu0 %v760_v8 }
   0xb   :  { %448 = vmatpush.bf16.msra.mxu1 %v768_v9 }
   0xc   :  { %461 = vmatpush.bf16.msra.mxu2 %v776_v10 }
   0xd   :  { %474 = vmatpush.bf16.msra.mxu3 %v784_v11 }
   0xe   :  { %436 = vmatpush.bf16.msra.mxu0 %v759_v12 }
   0xf   :  { %449 = vmatpush.bf16.msra.mxu1 %v767_v13 }
  0x10   :  { %10 = vsyncpa [#allocation3], 0  ;;  %462 = vmatpush.bf16.msra.mxu2 %v775_v14  ;;  %v774_v18 = vld [vmem:[%s1032_s1 + $0x98] sm:$0xff]  ;;  %v757_v20 = vld [vmem:[%s1032_s1 + $0x10] sm:$0xff]  ;;  %v511_v10 = vlaneseq  ;;  %s835_s23 = smov [#allocation2]   ;;  %s554_s27 = sshll.u32 %s1036_s5, 4  ;;  %s555_s27 = int_to_ptr.hbm [resolvable:$true] %s554_s27 }
  0x11   :  { %475 = vmatpush.bf16.msra.mxu3 %v783_v15  ;;  %v782_v19 = vld [vmem:[%s1032_s1 + $0xd8] sm:$0xff]  ;;  %v765_v21 = vld [vmem:[%s1032_s1 + $0x50] sm:$0xff]  ;;  %v756_v24 = vld [vmem:[%s1032_s1 + $0x8] sm:$0xff]  ;;  %s552_s24 = sshll.u32 %s835_s23, 4  ;;  %s553_s24 = int_to_ptr.vmem [resolvable:$true] %s552_s24 }
  0x12   :  { %437 = vmatpush.bf16.msra.mxu0 %v758_v16  ;;  %v773_v22 = vld [vmem:[%s1032_s1 + $0x90] sm:$0xff]  ;;  %v764_v25 = vld [vmem:[%s1032_s1 + $0x48] sm:$0xff]  ;;  %v21_v26 = vld [vmem:[%s1031_s0] sm:$0xff]  ;;  %v512_v12 = vand.u32 127, %v511_v10 }
  0x13   :  { %450 = vmatpush.bf16.msra.mxu1 %v766_v17  ;;  %v781_v23 = vld [vmem:[%s1032_s1 + $0xd0] sm:$0xff]  ;;  %v772_v27 = vld [vmem:[%s1032_s1 + $0x88] sm:$0xff]  ;;  %v127_v28 = vunpack.c.l.b16 %v21_v26  ;;  %v128_v30 = vunpack.c.h.b16 %v21_v26  ;;  %v755_v32 = vld [vmem:[%s1032_s1] sm:$0xff] }
  0x14   :  { %463 = vmatpush.bf16.msra.mxu2 %v774_v18  ;;  %v780_v29 = vld [vmem:[%s1032_s1 + $0xc8] sm:$0xff]  ;;  %v763_v33 = vld [vmem:[%s1032_s1 + $0x40] sm:$0xff]  ;;  %v794_v34 = vld [vmem:[%s1032_s1 + $0x138] sm:$0xff]  ;;  %vm513_vm0 = vcmp.lt.s32.totalorder %v512_v12, 32 }
  0x15   :  { %476 = vmatpush.bf16.msra.mxu3 %v782_v19  ;;  %v22_v31 = vld [vmem:[%s1031_s0 + $0x8] sm:$0xff]  ;;  %v802_v35 = vld [vmem:[%s1032_s1 + $0x178] sm:$0xff]  ;;  %v771_v36 = vld [vmem:[%s1032_s1 + $0x80] sm:$0xff]  ;;  %v133_v38 = vpack.c.b16 %v127_v28, %v127_v28  ;;  %v134_v39 = vpack.c.b16 %v128_v30, %v128_v30 }
  0x16   :  { %438 = vmatpush.bf16.msra.mxu0 %v757_v20  ;;  %v129_v37 = vunpack.c.l.b16 %v22_v31  ;;  %v130_v40 = vunpack.c.h.b16 %v22_v31  ;;  %v779_v41 = vld [vmem:[%s1032_s1 + $0xc0] sm:$0xff]  ;;  %v793_v42 = vld [vmem:[%s1032_s1 + $0x130] sm:$0xff]  ;;  %v792_v46 = vld [vmem:[%s1032_s1 + $0x128] sm:$0xff] }
  0x17   :  { %451 = vmatpush.bf16.msra.mxu1 %v765_v21  ;;  %v801_v43 = vld [vmem:[%s1032_s1 + $0x170] sm:$0xff]  ;;  %v800_v47 = vld [vmem:[%s1032_s1 + $0x168] sm:$0xff]  ;;  %v791_v48 = vld [vmem:[%s1032_s1 + $0x120] sm:$0xff] }
  0x18   :  { %464 = vmatpush.bf16.msra.mxu2 %v773_v22  ;;  %v135_v44 = vpack.c.b16 %v129_v37, %v129_v37  ;;  %v136_v45 = vpack.c.b16 %v130_v40, %v130_v40  ;;  %v799_v49 = vld [vmem:[%s1032_s1 + $0x160] sm:$0xff]  ;;  %v790_v50 = vld [vmem:[%s1032_s1 + $0x118] sm:$0xff]  ;;  %v789_v52 = vld [vmem:[%s1032_s1 + $0x110] sm:$0xff] }
  0x19   :  { %477 = vmatpush.bf16.msra.mxu3 %v781_v23  ;;  %v798_v51 = vld [vmem:[%s1032_s1 + $0x158] sm:$0xff]  ;;  %v797_v53 = vld [vmem:[%s1032_s1 + $0x150] sm:$0xff]  ;;  %v788_v54 = vld [vmem:[%s1032_s1 + $0x108] sm:$0xff] }
  0x1a   :  { %439 = vmatpush.bf16.msra.mxu0 %v756_v24  ;;  %v796_v55 = vld [vmem:[%s1032_s1 + $0x148] sm:$0xff]  ;;  %v23_v56 = vld [vmem:[%s1031_s0 + $0x10] sm:$0xff]  ;;  %v787_v59 = vld [vmem:[%s1032_s1 + $0x100] sm:$0xff] }
  0x1b   :  { %452 = vmatpush.bf16.msra.mxu1 %v764_v25  ;;  %v131_v57 = vunpack.c.l.b16 %v23_v56  ;;  %v132_v58 = vunpack.c.h.b16 %v23_v56  ;;  %v795_v60 = vld [vmem:[%s1032_s1 + $0x140] sm:$0xff] }
  0x1c   :  { %465 = vmatpush.bf16.msra.mxu2 %v772_v27  ;;  %v804_v5 = vld [vmem:[%s1033_s2] ss:$0 sm:$0xff] }
  0x1d   :  { %478 = vmatpush.bf16.msra.mxu3 %v780_v29  ;;  %v137_v61 = vpack.c.b16 %v131_v57, %v131_v57  ;;  %v138_v62 = vpack.c.b16 %v132_v58, %v132_v58 }
  0x1e   :  { %440 = vmatpush.bf16.msra.mxu0 %v755_v32 }
  0x1f   :  { %453 = vmatpush.bf16.msra.mxu1 %v763_v33 }
  0x20   :  { %466 = vmatpush.bf16.msra.mxu2 %v771_v36 }
  0x21   :  { %441 = vmatmul.bf16.vlgmr.msra.gmra.mxu0 %v133_v38  ;;  %479 = vmatpush.bf16.msra.mxu3 %v779_v41  ;;  %v806_v38 = vld [vmem:[%s1035_s4] ss:$0 sm:$0xff] }
  0x22   :  { %485 = vmatpush.bf16.msrb.mxu0 %v794_v34  ;;  %454 = vmatmul.bf16.vlgmr.msra.gmra.mxu1 %v134_v39 }
  0x23   :  { %498 = vmatpush.bf16.msrb.mxu1 %v802_v35  ;;  %467 = vmatmul.bf16.vlgmr.msra.gmra.mxu2 %v135_v44  ;;  %v805_v35 = vld [vmem:[%s1034_s3] ss:$0 sm:$0xff] }
  0x24   :  { %480 = vmatmul.bf16.vlgmr.msra.gmra.mxu3 %v136_v45 }
  0x26   :  { %486 = vmatpush.bf16.msrb.mxu0 %v793_v42 }
  0x27   :  { %499 = vmatpush.bf16.msrb.mxu1 %v801_v43 }
  0x2a   :  { %487 = vmatpush.bf16.msrb.mxu0 %v792_v46 }
  0x2b   :  { %500 = vmatpush.bf16.msrb.mxu1 %v800_v47 }
  0x2e   :  { %488 = vmatpush.bf16.msrb.mxu0 %v791_v48 }
  0x2f   :  { %501 = vmatpush.bf16.msrb.mxu1 %v799_v49 }
  0x32   :  { %489 = vmatpush.bf16.msrb.mxu0 %v790_v50 }
  0x33   :  { %502 = vmatpush.bf16.msrb.mxu1 %v798_v51 }
  0x36   :  { %490 = vmatpush.bf16.msrb.mxu0 %v789_v52 }
  0x37   :  { %503 = vmatpush.bf16.msrb.mxu1 %v797_v53 }
  0x3a   :  { %491 = vmatpush.bf16.msrb.mxu0 %v788_v54 }
  0x3b   :  { %504 = vmatpush.bf16.msrb.mxu1 %v796_v55 }
  0x3e   :  { %492 = vmatpush.bf16.msrb.mxu0 %v787_v59 }
  0x3f   :  { %505 = vmatpush.bf16.msrb.mxu1 %v795_v60 }
  0x41   :  { %493 = vmatmul.bf16.vlgmr.msrb.gmra.mxu0 %v137_v61 }
  0x42   :  { %506 = vmatmul.bf16.vlgmr.msrb.gmra.mxu1 %v138_v62 }
  0x9e   :  { %v442_v63 = vpop.f32.mrf.mxu0 }
  0x9f   :  { %v455_v0 = vpop.f32.mrf.mxu1  ;;  %v443_v6 = vadd.f32 %v804_v5, %v442_v63 }
  0xa1   :  { %v456_v9 = vadd.f32 %v455_v0, %v443_v6 }
  0xa6   :  { %v444_v1 = vpop.f32.mrf.mxu0  ;;  %v468_v3 = vpop.f32.mrf.mxu2 }
  0xa7   :  { %v457_v2 = vpop.f32.mrf.mxu1  ;;  %v481_v4 = vpop.f32.mrf.mxu3  ;;  %v469_v11 = vadd.f32 %v468_v3, %v456_v9 }
  0xa9   :  { %v482_v13 = vadd.f32 %v481_v4, %v469_v11 }
  0xae   :  { %v470_v7 = vpop.f32.mrf.mxu2 }
  0xaf   :  { %v483_v8 = vpop.f32.mrf.mxu3 }
  0xbe   :  { %v494_v14 = vpop.f32.mrf.mxu0 }
  0xbf   :  { %v507_v15 = vpop.f32.mrf.mxu1  ;;  %v495_v16 = vadd.f32 %v494_v14, %v482_v13 }
  0xc1   :  { %v508_v17 = vadd.f32 %v507_v15, %v495_v16 }
  0xc3   :  { %v514_v18 = vsel %vm513_vm0, %v508_v17, 0.0 }
  0xc4   :  { %515 = vadd.xlane.f32.xlu0 %v514_v18 }
  0xc6   :  { %v496_v19 = vpop.f32.mrf.mxu0 }
  0xc7   :  { %v509_v20 = vpop.f32.mrf.mxu1 }
 0x137   :  { %v516_v21 = vpop.xlane.xlu0 %515 }
 0x138   :  { %v517_v22 = vmul.f32 0.03125, %v516_v21 }
 0x13a   :  { %v518_v23 = vsub.f32 %v514_v18, %v517_v22 }
 0x13c   :  { %v519_v24 = vsel %vm513_vm0, %v518_v23, 0.0 }
 0x13d   :  { %v520_v25 = vmul.f32 %v519_v24, %v519_v24 }
 0x13f   :  { %521 = vadd.xlane.f32.xlu0 %v520_v25 }
 0x1b2   :  { %v522_v26 = vpop.xlane.xlu0 %521 }
 0x1b3   :  { %v523_v27 = vmul.f32 0.03125, %v522_v26 }
 0x1b5   :  { %v524_v28 = vadd.f32 1e-06, %v523_v27 }
 0x1b7   :  { %807 = vrsqrt.f32 %v524_v28  ;;  %vm531_vm2 = vweird.f32 %v524_v28 }
 0x1bd   :  { %v808_v29 = vpop.eup %807 }
 0x1be   :  { %v526_v30 = vmul.f32 %v808_v29, %v524_v28  ;;  %vm532_vm1 = vweird.f32 %v808_v29 }
 0x1bf   :  { %vm533_vm3 = vmor %vm531_vm2, %vm532_vm1 }
 0x1c0   :  { %v527_v31 = vmul.f32 %v808_v29, %v526_v30 }
 0x1c2   :  { %v528_v32 = vmul.f32 0.5, %v527_v31 }
 0x1c4   :  { %v529_v33 = vsub.f32 1.5, %v528_v32 }
 0x1c6   :  { %v530_v34 = vmul.f32 %v808_v29, %v529_v33 }
 0x1c8   :  { %v534_v36 = vsel %vm533_vm3, %v808_v29, %v530_v34 }
 0x1c9   :  { %v535_v37 = vmul.f32 %v534_v36, %v519_v24 }
 0x1cb   :  { %v540_v39 = vmul.f32 %v805_v35, %v535_v37 }
 0x1cd   :  { %v545_v40 = vadd.f32 %v806_v38, %v540_v39 }
 0x1cf   :  { %546 = vst [vmem:[#allocation2] sm:$0xff] %v545_v40 }
 0x1d0   :  { %557 = dma.vmem_to_hbm [thread:$0]  %s553_s24, 128, %s555_s27, [#allocation3]  }
 0x1d1   :  { %833 = dma.done.wait [#allocation3], 128  }
 0x1d2   :  { %834 = vsyncadd [#allocation3], 4294967168 }
 0x1d3   :  { %562 = vsyncpa [#allocation3], 1 }

</bundles_post_ra>
